<compile_context>
chip_gen: v6e
topology: v6e:2x2x1
jax: 0.10.0
libtpu: 0.0.40
codegen_flags: <defaults>
</compile_context>

<pallas_src>
import numpy as np
import jax
import jax.numpy as jnp
from jax.experimental import pallas as pl
from jax.experimental.pallas import tpu as pltpu


def ghu_kernel(p_ref, w_ref, g_ref, b_ref, z_ref, o_ref):
    """One batch sample per grid step (leading batch dim squeezed away).

    p_ref : (Ppad, WW) bf16  im2col patches of x and z + ones row + zero pad
    w_ref : (2*C2, Ppad) bf16 block-diag conv weights, bias col, zero pad
    g_ref : (2*C2, WW) f32   LayerNorm gammas (x-branch rows, then z-branch)
    b_ref : (2*C2, WW) f32   LayerNorm betas
    z_ref : (Ch, WW)   f32   current z (highway mix input)
    o_ref : (Ch, WW)   f32   z_new
    """
    eps = 1e-5
    ch = o_ref.shape[0]           # num_hidden
    c2 = 2 * ch                   # per-conv output channels

    # Fused conv_x / conv_z (+bias) as one MXU matmul -> (2*c2, WW), f32 acc.
    raw = jnp.dot(w_ref[...], p_ref[...], preferred_element_type=jnp.float32)
    xc = raw[:c2, :]
    zc = raw[c2:, :]

    # Per-branch, per-sample LayerNorm over the whole (c2, WW) slab.
    # Single-pass biased statistics: var = E[x^2] - mean^2, eps = 1e-5.
    inv_n = 1.0 / float(c2 * xc.shape[1])
    mx = jnp.sum(xc) * inv_n
    vx = jnp.sum(xc * xc) * inv_n - mx * mx
    mz = jnp.sum(zc) * inv_n
    vz = jnp.sum(zc * zc) * inv_n - mz * mz

    xn = (xc - mx) * jax.lax.rsqrt(vx + eps) * g_ref[:c2, :] + b_ref[:c2, :]
    zn = (zc - mz) * jax.lax.rsqrt(vz + eps) * g_ref[c2:, :] + b_ref[c2:, :]

    gates = xn + zn
    p = jnp.tanh(gates[:ch, :])
    u = jax.nn.sigmoid(gates[ch:, :])
    zcur = z_ref[...]
    # u*p + (1-u)*z  ==  z + u*(p - z)
    o_ref[...] = zcur + u * (p - zcur)


def _im2col(x, K, pad):
    """x: [B, C, H, W] -> patches [B, C*K*K, H*W], row order = (c, kh, kw).

    Channels stay leading, spatial stays trailing: no transposes needed.
    """
    B, C, H, W = x.shape
    xp = jnp.pad(x, ((0, 0), (0, 0), (pad, pad), (pad, pad)))
    cols = [xp[:, :, kh:kh + H, kw:kw + W]
            for kh in range(K) for kw in range(K)]       # each [B, C, H, W]
    pat = jnp.stack(cols, axis=2)                        # [B, C, K*K, H, W]
    return pat.reshape(B, C * K * K, H * W)


def _round_up(v, m):
    return (v + m - 1) // m * m


def ghu_forward(x, z, params, num_hidden, filter_size):
    """x: [B, Cin, W, W] (NCHW), z: [B, num_hidden, W, W] -> z_new (NCHW)."""
    B, Cin, H, W = x.shape
    Ch = num_hidden
    K = filter_size
    pad = K // 2
    WW = H * W
    C2 = 2 * Ch
    PX = Cin * K * K
    PZ = Ch * K * K
    P1 = PX + PZ + 1                      # +1 ones-row (folds the conv bias)
    PPAD = _round_up(P1, 128)             # aligned MXU contraction dim

    # Fused patch tensor: x patches, z patches, ones row, zero pad. bf16 MXU.
    xp = _im2col(x, K, pad)                              # [B, PX, WW]
    zp = _im2col(z, K, pad)                              # [B, PZ, WW]
    ones = jnp.ones((B, 1, WW), jnp.float32)
    zpad = jnp.zeros((B, PPAD - P1, WW), jnp.float32)
    patches = jnp.concatenate([xp, zp, ones, zpad], axis=1).astype(jnp.bfloat16)

    # Block-diagonal fused weight; biases in the ones-row column; zero pad.
    wx = params['wx'].reshape(C2, PX)
    wz = params['wz'].reshape(C2, PZ)
    w_full = jnp.zeros((2 * C2, PPAD), jnp.float32)
    w_full = w_full.at[:C2, :PX].set(wx)
    w_full = w_full.at[C2:, PX:PX + PZ].set(wz)
    w_full = w_full.at[:C2, P1 - 1].set(params['bx'])
    w_full = w_full.at[C2:, P1 - 1].set(params['bz'])
    w_full = w_full.astype(jnp.bfloat16)

    # LayerNorm affine params: natively [C2, H, W] -> pure reshape to (C2, WW).
    gamma = jnp.concatenate([params['gx'].reshape(C2, WW),
                             params['gz'].reshape(C2, WW)], axis=0)
    beta = jnp.concatenate([params['bxl'].reshape(C2, WW),
                            params['bzl'].reshape(C2, WW)], axis=0)

    zf = z.reshape(B, Ch, WW)                            # pure reshape (NCHW)

    out = pl.pallas_call(
        ghu_kernel,
        out_shape=jax.ShapeDtypeStruct((B, Ch, WW), jnp.float32),
        grid=(B,),
        in_specs=[
            pl.BlockSpec((None, PPAD, WW), lambda b: (b, 0, 0)),  # patches
            pl.BlockSpec((2 * C2, PPAD), lambda b: (0, 0)),       # fused W
            pl.BlockSpec((2 * C2, WW), lambda b: (0, 0)),         # LN gamma
            pl.BlockSpec((2 * C2, WW), lambda b: (0, 0)),         # LN beta
            pl.BlockSpec((None, Ch, WW), lambda b: (b, 0, 0)),    # z
        ],
        out_specs=pl.BlockSpec((None, Ch, WW), lambda b: (b, 0, 0)),
        compiler_params=pltpu.CompilerParams(
            dimension_semantics=("parallel",)),
    )(patches, w_full, gamma, beta, zf)

    return out.reshape(B, Ch, H, W)                      # pure reshape back


def ghu_reference(x, z, params, num_hidden, filter_size):
    """Pure-JAX reference matching the PyTorch module semantics."""
    pad = filter_size // 2

    def conv_ln(inp, w, b, gamma, beta):
        out = jax.lax.conv_general_dilated(
            inp, w, window_strides=(1, 1), padding=[(pad, pad), (pad, pad)],
            dimension_numbers=('NCHW', 'OIHW', 'NCHW'))
        out = out + b[None, :, None, None]
        mean = out.mean(axis=(1, 2, 3), keepdims=True)
        var = ((out - mean) ** 2).mean(axis=(1, 2, 3), keepdims=True)
        return (out - mean) / jnp.sqrt(var + 1e-5) * gamma[None] + beta[None]

    xc = conv_ln(x, params['wx'], params['bx'], params['gx'], params['bxl'])
    zc = conv_ln(z, params['wz'], params['bz'], params['gz'], params['bzl'])
    gates = xc + zc
    p = jnp.tanh(gates[:, :num_hidden])
    u = jax.nn.sigmoid(gates[:, num_hidden:])
    return u * p + (1.0 - u) * z


if __name__ == "__main__":
    # GHU(in_channel=4, num_hidden=8, width=16, filter_size=3, stride=1)
    B, Cin, Ch, W, K = 2, 4, 8, 16, 3

    key = jax.random.PRNGKey(0)
    ks = jax.random.split(key, 10)
    x = jax.random.normal(ks[0], (B, Cin, W, W), jnp.float32)
    z = jax.random.normal(ks[1], (B, Ch, W, W), jnp.float32)

    params = {
        # conv_x: Conv2d(Cin -> 2*Ch, KxK)
        'wx': 0.1 * jax.random.normal(ks[2], (2 * Ch, Cin, K, K), jnp.float32),
        'bx': 0.1 * jax.random.normal(ks[3], (2 * Ch,), jnp.float32),
        # conv_z: Conv2d(Ch -> 2*Ch, KxK)
        'wz': 0.1 * jax.random.normal(ks[4], (2 * Ch, Ch, K, K), jnp.float32),
        'bz': 0.1 * jax.random.normal(ks[5], (2 * Ch,), jnp.float32),
        # LayerNorm([2*Ch, W, W]) affine params (randomized to exercise path)
        'gx': 1.0 + 0.1 * jax.random.normal(ks[6], (2 * Ch, W, W), jnp.float32),
        'bxl': 0.1 * jax.random.normal(ks[7], (2 * Ch, W, W), jnp.float32),
        'gz': 1.0 + 0.1 * jax.random.normal(ks[8], (2 * Ch, W, W), jnp.float32),
        'bzl': 0.1 * jax.random.normal(ks[9], (2 * Ch, W, W), jnp.float32),
    }

    z_new = ghu_forward(x, z, params, Ch, K)
    z_new = jax.block_until_ready(z_new)

    z_ref = ghu_reference(x, z, params, Ch, K)
    np.testing.assert_allclose(np.asarray(z_new), np.asarray(z_ref),
                               rtol=5e-2, atol=5e-2)
    print("KERNEL_OK")
</pallas_src>

<mosaic_0001>
module attributes {stable_mosaic.version = 11 : i64} {
  func.func @ghu_kernel(%arg0: i32, %arg1: memref<1x128x256xbf16, #tpu.memory_space<vmem>>, %arg2: memref<32x128xbf16, #tpu.memory_space<vmem>>, %arg3: memref<32x256xf32, #tpu.memory_space<vmem>>, %arg4: memref<32x256xf32, #tpu.memory_space<vmem>>, %arg5: memref<1x8x256xf32, #tpu.memory_space<vmem>>, %arg6: memref<1x8x256xf32, #tpu.memory_space<vmem>>) attributes {dimension_semantics = [#tpu.dimension_semantics<parallel>], iteration_bounds = array<i64: 2>, scalar_prefetch = 0 : i64, scratch_operands = 0 : i64, tpu.core_type = #tpu.core_type<tc>, window_params = [{transform_indices = @transform_0, window_bounds = array<i64: 1, 128, 256>}, {pipeline_mode = #tpu.pipeline_mode<synchronous>, transform_indices = @transform_1, window_bounds = array<i64: 32, 128>}, {pipeline_mode = #tpu.pipeline_mode<synchronous>, transform_indices = @transform_2, window_bounds = array<i64: 32, 256>}, {pipeline_mode = #tpu.pipeline_mode<synchronous>, transform_indices = @transform_3, window_bounds = array<i64: 32, 256>}, {transform_indices = @transform_4, window_bounds = array<i64: 1, 8, 256>}, {transform_indices = @transform_5, window_bounds = array<i64: 1, 8, 256>}]} {
    %c0 = arith.constant 0 : index
    %c0_0 = arith.constant 0 : index
    %0 = vector.load %arg2[%c0, %c0_0] : memref<32x128xbf16, #tpu.memory_space<vmem>>, vector<32x128xbf16>
    %c0_1 = arith.constant 0 : index
    %c0_2 = arith.constant 0 : index
    %c0_3 = arith.constant 0 : index
    %1 = vector.load %arg1[%c0_1, %c0_2, %c0_3] : memref<1x128x256xbf16, #tpu.memory_space<vmem>>, vector<1x128x256xbf16>
    %2 = vector.shape_cast %1 : vector<1x128x256xbf16> to vector<128x256xbf16>
    %cst = arith.constant dense<0.000000e+00> : vector<32x256xf32>
    %3 = tpu.matmul %0, %2, %cst {dimension_numbers = #tpu.dot_dimension_numbers<[1], [0], [0], [1], [0, 0, 1, 1], [], []>} : vector<32x128xbf16>, vector<128x256xbf16>, vector<32x256xf32> -> vector<32x256xf32>
    %4 = vector.extract_strided_slice %3 {offsets = [0, 0], sizes = [16, 256], strides = [1, 1]} : vector<32x256xf32> to vector<16x256xf32>
    %5 = vector.extract_strided_slice %3 {offsets = [16, 0], sizes = [16, 256], strides = [1, 1]} : vector<32x256xf32> to vector<16x256xf32>
    %6 = vector.shape_cast %4 : vector<16x256xf32> to vector<1x16x256xf32>
    %cst_4 = arith.constant dense<0.000000e+00> : vector<1xf32>
    %7 = vector.multi_reduction <add>, %6, %cst_4 [1, 2] : vector<1x16x256xf32> to vector<1xf32>
    %8 = vector.shape_cast %7 : vector<1xf32> to vector<1x1x1xf32>
    %9 = vector.extract %8[0, 0, 0] : f32 from vector<1x1x1xf32>
    %cst_5 = arith.constant 2.44140625E-4 : f32
    %10 = arith.mulf %9, %cst_5 : f32
    %11 = arith.mulf %4, %4 : vector<16x256xf32>
    %12 = vector.shape_cast %11 : vector<16x256xf32> to vector<1x16x256xf32>
    %cst_6 = arith.constant dense<0.000000e+00> : vector<1xf32>
    %13 = vector.multi_reduction <add>, %12, %cst_6 [1, 2] : vector<1x16x256xf32> to vector<1xf32>
    %14 = vector.shape_cast %13 : vector<1xf32> to vector<1x1x1xf32>
    %15 = vector.extract %14[0, 0, 0] : f32 from vector<1x1x1xf32>
    %cst_7 = arith.constant 2.44140625E-4 : f32
    %16 = arith.mulf %15, %cst_7 : f32
    %17 = arith.mulf %10, %10 : f32
    %18 = arith.subf %16, %17 : f32
    %19 = vector.shape_cast %5 : vector<16x256xf32> to vector<1x16x256xf32>
    %cst_8 = arith.constant dense<0.000000e+00> : vector<1xf32>
    %20 = vector.multi_reduction <add>, %19, %cst_8 [1, 2] : vector<1x16x256xf32> to vector<1xf32>
    %21 = vector.shape_cast %20 : vector<1xf32> to vector<1x1x1xf32>
    %22 = vector.extract %21[0, 0, 0] : f32 from vector<1x1x1xf32>
    %cst_9 = arith.constant 2.44140625E-4 : f32
    %23 = arith.mulf %22, %cst_9 : f32
    %24 = arith.mulf %5, %5 : vector<16x256xf32>
    %25 = vector.shape_cast %24 : vector<16x256xf32> to vector<1x16x256xf32>
    %cst_10 = arith.constant dense<0.000000e+00> : vector<1xf32>
    %26 = vector.multi_reduction <add>, %25, %cst_10 [1, 2] : vector<1x16x256xf32> to vector<1xf32>
    %27 = vector.shape_cast %26 : vector<1xf32> to vector<1x1x1xf32>
    %28 = vector.extract %27[0, 0, 0] : f32 from vector<1x1x1xf32>
    %cst_11 = arith.constant 2.44140625E-4 : f32
    %29 = arith.mulf %28, %cst_11 : f32
    %30 = arith.mulf %23, %23 : f32
    %31 = arith.subf %29, %30 : f32
    %32 = vector.broadcast %10 : f32 to vector<16x256xf32>
    %33 = arith.subf %4, %32 : vector<16x256xf32>
    %cst_12 = arith.constant 9.99999974E-6 : f32
    %34 = arith.addf %18, %cst_12 : f32
    %35 = math.rsqrt %34 : f32
    %36 = vector.broadcast %35 : f32 to vector<16x256xf32>
    %37 = arith.mulf %33, %36 : vector<16x256xf32>
    %c0_13 = arith.constant 0 : index
    %c0_14 = arith.constant 0 : index
    %38 = vector.load %arg3[%c0_13, %c0_14] : memref<32x256xf32, #tpu.memory_space<vmem>>, vector<16x256xf32>
    %39 = arith.mulf %37, %38 : vector<16x256xf32>
    %c0_15 = arith.constant 0 : index
    %c0_16 = arith.constant 0 : index
    %40 = vector.load %arg4[%c0_15, %c0_16] : memref<32x256xf32, #tpu.memory_space<vmem>>, vector<16x256xf32>
    %41 = arith.addf %39, %40 : vector<16x256xf32>
    %42 = vector.broadcast %23 : f32 to vector<16x256xf32>
    %43 = arith.subf %5, %42 : vector<16x256xf32>
    %cst_17 = arith.constant 9.99999974E-6 : f32
    %44 = arith.addf %31, %cst_17 : f32
    %45 = math.rsqrt %44 : f32
    %46 = vector.broadcast %45 : f32 to vector<16x256xf32>
    %47 = arith.mulf %43, %46 : vector<16x256xf32>
    %c16 = arith.constant 16 : index
    %c0_18 = arith.constant 0 : index
    %48 = vector.load %arg3[%c16, %c0_18] : memref<32x256xf32, #tpu.memory_space<vmem>>, vector<16x256xf32>
    %49 = arith.mulf %47, %48 : vector<16x256xf32>
    %c16_19 = arith.constant 16 : index
    %c0_20 = arith.constant 0 : index
    %50 = vector.load %arg4[%c16_19, %c0_20] : memref<32x256xf32, #tpu.memory_space<vmem>>, vector<16x256xf32>
    %51 = arith.addf %49, %50 : vector<16x256xf32>
    %52 = arith.addf %41, %51 : vector<16x256xf32>
    %53 = vector.extract_strided_slice %52 {offsets = [0, 0], sizes = [8, 256], strides = [1, 1]} : vector<16x256xf32> to vector<8x256xf32>
    %54 = math.tanh %53 : vector<8x256xf32>
    %55 = vector.extract_strided_slice %52 {offsets = [8, 0], sizes = [8, 256], strides = [1, 1]} : vector<16x256xf32> to vector<8x256xf32>
    %56 = arith.negf %55 : vector<8x256xf32>
    %57 = math.exp %56 : vector<8x256xf32>
    %cst_21 = arith.constant 1.000000e+00 : f32
    %58 = vector.broadcast %cst_21 : f32 to vector<8x256xf32>
    %59 = arith.addf %58, %57 : vector<8x256xf32>
    %60 = arith.divf %58, %59 : vector<8x256xf32>
    %c0_22 = arith.constant 0 : index
    %c0_23 = arith.constant 0 : index
    %c0_24 = arith.constant 0 : index
    %61 = vector.load %arg5[%c0_22, %c0_23, %c0_24] : memref<1x8x256xf32, #tpu.memory_space<vmem>>, vector<1x8x256xf32>
    %62 = vector.shape_cast %61 : vector<1x8x256xf32> to vector<8x256xf32>
    %63 = arith.subf %54, %62 : vector<8x256xf32>
    %64 = arith.mulf %60, %63 : vector<8x256xf32>
    %65 = arith.addf %62, %64 : vector<8x256xf32>
    %c0_25 = arith.constant 0 : index
    %c0_26 = arith.constant 0 : index
    %c0_27 = arith.constant 0 : index
    %66 = vector.load %arg6[%c0_25, %c0_26, %c0_27] : memref<1x8x256xf32, #tpu.memory_space<vmem>>, vector<1x8x256xf32>
    %67 = vector.shape_cast %66 : vector<1x8x256xf32> to vector<8x256xf32>
    %68 = vector.shape_cast %65 : vector<8x256xf32> to vector<1x8x256xf32>
    tpu.vector_store %arg6[%c0_25, %c0_26, %c0_27], %68 {strides = array<i32>} : memref<1x8x256xf32, #tpu.memory_space<vmem>>, vector<1x8x256xf32>,
    return
  }
  func.func @transform_0(%arg0: i32) -> (i32, i32, i32) {
    %c0_i32 = arith.constant 0 : i32
    %c0_i32_0 = arith.constant 0 : i32
    %c0_i32_1 = arith.constant 0 : i32
    return %arg0, %c0_i32, %c0_i32_0 : i32, i32, i32
  }
  func.func @transform_1(%arg0: i32) -> (i32, i32) {
    %c0_i32 = arith.constant 0 : i32
    %c0_i32_0 = arith.constant 0 : i32
    %c0_i32_1 = arith.constant 0 : i32
    return %c0_i32, %c0_i32_0 : i32, i32
  }
  func.func @transform_2(%arg0: i32) -> (i32, i32) {
    %c0_i32 = arith.constant 0 : i32
    %c0_i32_0 = arith.constant 0 : i32
    %c0_i32_1 = arith.constant 0 : i32
    return %c0_i32, %c0_i32_0 : i32, i32
  }
  func.func @transform_3(%arg0: i32) -> (i32, i32) {
    %c0_i32 = arith.constant 0 : i32
    %c0_i32_0 = arith.constant 0 : i32
    %c0_i32_1 = arith.constant 0 : i32
    return %c0_i32, %c0_i32_0 : i32, i32
  }
  func.func @transform_4(%arg0: i32) -> (i32, i32, i32) {
    %c0_i32 = arith.constant 0 : i32
    %c0_i32_0 = arith.constant 0 : i32
    %c0_i32_1 = arith.constant 0 : i32
    return %arg0, %c0_i32, %c0_i32_0 : i32, i32, i32
  }
  func.func @transform_5(%arg0: i32) -> (i32, i32, i32) {
    %c0_i32 = arith.constant 0 : i32
    %c0_i32_0 = arith.constant 0 : i32
    %c0_i32_1 = arith.constant 0 : i32
    return %arg0, %c0_i32, %c0_i32_0 : i32, i32, i32
  }
}

</mosaic_0001>

<bundles_post_ra>
// kernel: tpu_custom_call.1
= control target key start
LH: loop header
LB: loop body
LE: loop exit
PB: predicated region body
PF: predicated region fallthrough
CT: control target
= control target key end

     0   :  { %s1536_s0 = inlined_call_operand.hbm [shape: bf16[2,128,256], index: 0, kind: input, shape index: {}]   ;;  %s1537_s1 = inlined_call_operand.hbm [shape: bf16[32,128], index: 1, kind: input, shape index: {}]   ;;  %s1538_s2 = inlined_call_operand.hbm [shape: f32[32,256], index: 2, kind: input, shape index: {}]   ;;  %s1539_s3 = inlined_call_operand.hbm [shape: f32[32,256], index: 3, kind: input, shape index: {}]   ;;  %s1540_s4 = inlined_call_operand.hbm [shape: f32[2,8,256], index: 4, kind: input, shape index: {}]   ;;  %s1541_s5 = inlined_call_operand.hbm [shape: f32[2,8,256], index: 5, kind: output, shape index: {}]  }
   0x1   :  { %1547 = sst [smem:[#allocation18_spill]] %s1536_s0 }
   0x2   :  { %1548 = sst [smem:[#allocation19_spill]] %s1537_s1 }
   0x3   :  { %1549 = sst [smem:[#allocation20_spill]] %s1538_s2 }
   0x4   :  { %10 = vsyncpa [#allocation3], 0 }
   0x5   :  { %12 = vsyncpa [#allocation3 + $0x1], 0 }
   0x6   :  { %13 = vsyncpa [#allocation6], 0 }
   0x7   :  { %14 = vsyncpa [#allocation9], 0 }
   0x8   :  { %15 = vsyncpa [#allocation4], 0 }
   0x9   :  { %17 = vsyncpa [#allocation4 + $0x1], 0  ;;  %s1235_s18 = smov 0   ;;  %s1237_s19 = smov 0  }
   0xa   :  { %s1239_s20 = smov 0   ;;  %s1241_s21 = smov 0  }
   0xb LB: > { %s1256_s22 = sadd.s32 4294967295, %s1190_s21   ;;  %s774_s23 = sadd.s32 4294967294, %s1190_s21   ;;  %s1190_s21 = sphi %s1241_s21, %s1575_s21   ;;  %s1186_s20 = sphi %s1239_s20, %s1574_s20   ;;  %s1182_s19 = sphi %s1237_s19, %s1573_s19   ;;  %s1178_s18 = sphi %s1235_s18, %s1572_s18  }
   0xc   : > { %p43_p0 = scmp.ne.s32.totalorder %s1182_s19, %s1178_s18  ;;  %p1542_p1 = scmp.eq.s32.totalorder %s1256_s22, 0 }
   0xd   : > { %p156_p2 = scmp.eq.s32.totalorder %s1256_s22, 1  ;;  %p162_p3 = scmp.eq.s32.totalorder %s774_s23, 1 }
   0xe   : > { %p1265_p4 = por %p1542_p1, %p43_p0  ;;  %p775_p5 = scmp.ge.s32.totalorder %s1190_s21, 1 }
   0xf   : > { %p1270_p6 = por %p162_p3, %p43_p0  ;;  %p169_p7 = scmp.lt.s32.totalorder %s1190_s21, 3 }
  0x10   : > { %s1550_s24 = scalar_select %p1265_p4, 1, 0 }
  0x11   : > { %s1551_s25 = scalar_select %p1270_p6, 1, 0 }
  0x12   : > { %p1275_p8 = pnand %p775_p5, %p169_p7  ;;  %s1192_s27 = smov [#allocation5]  }
  0x13   : > { %s181_s28 = sshll.u32 %s1192_s27, 4  ;;  %s1289_s30 = sadd.s32 1, %s1190_s21   ;;  %s182_s28 = int_to_ptr.vmem [resolvable:$true] %s181_s28 }
  0x14   : > { %s1552_s26 = scalar_select %p1275_p8, 1, 0 }
  0x15   : > { %p867_p9 = pneg %p1275_p8  ;;  %s30_s6 = sadd.s32 1, %s1186_s20 }
  0x16   : > { %s27_s7 = ssub.s32 %s1190_s21, %s1289_s30  ;;  %s991_s8 = scalar_lea.vmem %s182_s28, 256 }
  0x17   : > { %p1284_p11 = pnand %p867_p9, %p1542_p1  ;;  %p992_p13 = scmp.ne.s32.totalorder %s182_s28, %s991_s8 }
  0x18   : > { %p999_p5 = scmp.lt.s32.totalorder %s182_s28, %s182_s28  ;;  %p1000_p7 = scmp.lt.s32.totalorder %s991_s8, %s991_s8 }
  0x19   : > { %p1543_p12 = pneg %p1284_p11 }
  0x1a   : > { %p1001_p9 = por %p1000_p7, %p999_p5 }
  0x1b   : > { %p994_p0 = pnand %p992_p13, %p1543_p12 }
  0x1d   : > { %p995_p3 = pneg %p994_p0 }
  0x1f   : > { %p1002_p10 = pnand %p1001_p9, %p995_p3 }
  0x21   : > { %1005 = shalt.err (!%p1002_p10)
}
  0x22   : > { %s1193_s9 = smov 64   ;;  %s1194_s10 = smov 4  }
  0x23   : > { %s1554_s1 = sld [smem:[#allocation19_spill]]  ;;  %p28_p13 = scmp.eq.s32.totalorder %s27_s7, 0 }
  0x24   : > { %p37_p10 = scmp.ne.s32.totalorder %s1186_s20, %s1182_s19  ;;  %p38_p0 = scmp.eq.s32.totalorder %s1190_s21, 0 }
  0x25   : > { %p891_p3 = scmp.lt.s32.totalorder %s1190_s21, 2  ;;  %s221_s15 = sand.u32 1, %s1190_s21  }
  0x26   : > { %s1309_s13 = scalar_select %p28_p13, %s1186_s20, %s30_s6  }
  0x27   : > { %p39_p5 = por %p38_p0, %p37_p10  ;;  %p1313_p7 = por %p156_p2, %p37_p10 }
  0x28   : > { %1555 = sst [smem:[#allocation17_spill]] %s1309_s13  ;;  %s223_s16 = sand.u32 1, %s1186_s20  }
  0x29   : > { %870 = dma.hbm_to_vmem [thread:$0]  (!%p1284_p11), %s1554_s1, 256, %s182_s28, [#allocation6], %s1193_s9, %s1193_s9, %s1194_s10  }
  0x2a   : > { %s1556_s14 = scalar_select %p1313_p7, 1, 0 }
  0x2b   : > { %s780_s17 = sshll.u32 %s223_s16, 7  ;;  %s818_s23 = sshll.u32 %s1190_s21, 11 }
  0x2c   : > { %s1557_s0 = sld [smem:[#allocation18_spill]]  ;;  %s225_s6 = scalar_lea.vmem [#allocation2], %s780_s17 }
  0x2d   : > { %s232_s7 = sshll.u32 %s225_s6, 4  ;;  %p1329_p2 = pnand %p891_p3, %p39_p5  ;;  %s1327_s7 = int_to_ptr.vmem [resolvable:$true] %s232_s7 }
  0x2e   : > { %s1333_s10 = scalar_lea.sflag [#allocation3], %s221_s15 }
  0x2f   : > { %p1008_p13 = pneg %p1329_p2 }
  0x32   : > { %s1325_s28 = scalar_lea.hbm %s1557_s0, %s818_s23  ;;  %s1011_s23 = scalar_lea.hbm %s1557_s0, 4096 }
  0x33   : > { %s1006_s11 = scalar_lea.hbm %s1325_s28, 2048  ;;  %p1012_p3 = scmp.lt.s32.totalorder %s1325_s28, %s1557_s0 }
  0x34   : > { %p1007_p9 = scmp.ne.s32.totalorder %s1325_s28, %s1006_s11  ;;  %p1013_p5 = scmp.lt.s32.totalorder %s1011_s23, %s1006_s11 }
  0x36   : > { %p1009_p10 = pnand %p1008_p13, %p1007_p9  ;;  %p1014_p1 = por %p1013_p5, %p1012_p3 }
  0x38   : > { %p1010_p0 = pneg %p1009_p10 }
  0x3a   : > { %p1015_p12 = pnand %p1014_p1, %p1010_p0 }
  0x3c   : > { %1018 = shalt.err (!%p1015_p12)
}
  0x3d   : > { %s1019_s15 = scalar_lea.vmem %s1327_s7, 2048  ;;  %s1195_s6 = smov [#allocation2]  }
  0x3e   : > { %p1020_p6 = scmp.ne.s32.totalorder %s1327_s7, %s1019_s15  ;;  %s1024_s12 = sshll.u32 %s1195_s6, 4  ;;  %s1025_s12 = int_to_ptr.vmem [resolvable:$false] %s1024_s12 }
  0x3f   : > { %s1026_s17 = scalar_lea.vmem %s1025_s12, 4096  ;;  %p1027_p7 = scmp.lt.s32.totalorder %s1327_s7, %s1025_s12 }
  0x40   : > { %p1022_p9 = pnand %p1020_p6, %p1008_p13  ;;  %p1028_p4 = scmp.lt.s32.totalorder %s1026_s17, %s1019_s15 }
  0x42   : > { %p1023_p10 = pneg %p1022_p9  ;;  %p1029_p8 = por %p1028_p4, %p1027_p7 }
  0x44   : > { %p1030_p3 = pnand %p1029_p8, %p1023_p10 }
  0x46   : > { %1033 = shalt.err (!%p1030_p3)
}
  0x47   : > { %s1196_s11 = smov 128   ;;  %s1197_s23 = smov 8  }
  0x48   : > { %880 = dma.hbm_to_vmem [thread:$0]  (!%p1329_p2), %s1325_s28, 2048, %s1327_s7, %s1333_s10, %s1196_s11, %s1196_s11, %s1197_s23  }
  0x49   : > { %s1198_s27 = smov [#allocation7]   ;;  %p1559_p6 = pneg %p1284_p11 }
  0x4a   : > { %s194_s8 = sshll.u32 %s1198_s27, 4  ;;  %s195_s8 = int_to_ptr.vmem [resolvable:$true] %s194_s8 }
  0x4b   : > { %s1045_s6 = scalar_lea.vmem %s195_s8, 1024  ;;  %p1053_p8 = scmp.lt.s32.totalorder %s195_s8, %s195_s8 }
  0x4c   : > { %p1046_p1 = scmp.ne.s32.totalorder %s195_s8, %s1045_s6  ;;  %p1054_p7 = scmp.lt.s32.totalorder %s1045_s6, %s1045_s6 }
  0x4e   : > { %p1048_p12 = pnand %p1046_p1, %p1559_p6  ;;  %p1055_p0 = por %p1054_p7, %p1053_p8 }
  0x50   : > { %p1049_p4 = pneg %p1048_p12 }
  0x52   : > { %p1056_p5 = pnand %p1055_p0, %p1049_p4 }
  0x54   : > { %1059 = shalt.err (!%p1056_p5)
}
  0x55   : > { %s1199_s15 = smov 256   ;;  %s1200_s28 = smov 16  }
  0x56   : > { %s1560_s2 = sld [smem:[#allocation20_spill]]  ;;  %s783_s17 = sshll.u32 %s223_s16, 4 }
  0x57   : > { %s1201_s11 = smov [#allocation8]   ;;  %s819_s27 = sshll.u32 %s1190_s21, 8 }
  0x58   : > { %s207_s23 = sshll.u32 %s1201_s11, 4  ;;  %p1561_p10 = pmov %p1559_p6  ;;  %s208_s23 = int_to_ptr.vmem [resolvable:$true] %s207_s23 }
  0x59   : > { %s1071_s6 = scalar_lea.vmem %s208_s23, 1024  ;;  %p1079_p6 = scmp.lt.s32.totalorder %s208_s23, %s208_s23 }
  0x5a   : > { %p1072_p9 = scmp.ne.s32.totalorder %s208_s23, %s1071_s6  ;;  %p1080_p12 = scmp.lt.s32.totalorder %s1071_s6, %s1071_s6 }
  0x5c   : > { %873 = dma.hbm_to_vmem [thread:$0]  (!%p1284_p11), %s1560_s2, 1024, %s195_s8, [#allocation6], %s1199_s15, %s1199_s15, %s1200_s28  }
  0x5d   : > { %p1074_p3 = pnand %p1072_p9, %p1561_p10  ;;  %p1081_p4 = por %p1080_p12, %p1079_p6 }
  0x5f   : > { %p1075_p1 = pneg %p1074_p3 }
  0x61   : > { %p1082_p8 = pnand %p1081_p4, %p1075_p1 }
  0x63   : > { %1085 = shalt.err (!%p1082_p8)
}
  0x64   : > { %876 = dma.hbm_to_vmem [thread:$0]  (!%p1284_p11), %s1539_s3, 1024, %s208_s23, [#allocation9], %s1199_s15, %s1199_s15, %s1200_s28  }
  0x65   : > { %s252_s11 = scalar_lea.hbm %s1540_s4, %s819_s27  ;;  %s246_s0 = scalar_lea.vmem [#allocation10], %s783_s17 }
  0x66   : > { %s254_s1 = sshll.u32 %s246_s0, 4  ;;  %s1086_s2 = scalar_lea.hbm %s252_s11, 256  ;;  %s255_s1 = int_to_ptr.vmem [resolvable:$true] %s254_s1 }
  0x67   : > { %p1087_p7 = scmp.ne.s32.totalorder %s252_s11, %s1086_s2  ;;  %s1091_s13 = scalar_lea.hbm %s1540_s4, 512 }
  0x68   : > { %p1092_p11 = scmp.lt.s32.totalorder %s252_s11, %s1540_s4  ;;  %p1093_p9 = scmp.lt.s32.totalorder %s1091_s13, %s1086_s2 }
  0x69   : > { %p1089_p0 = pnand %p1087_p7, %p1008_p13 }
  0x6a   : > { %p1094_p10 = por %p1093_p9, %p1092_p11 }
  0x6b   : > { %p1090_p5 = pneg %p1089_p0 }
  0x6d   : > { %p1095_p3 = pnand %p1094_p10, %p1090_p5 }
  0x6f   : > { %1098 = shalt.err (!%p1095_p3)
}
  0x70   : > { %s1099_s0 = scalar_lea.vmem %s255_s1, 256  ;;  %s1202_s15 = smov [#allocation10]  }
  0x71   : > { %p1100_p1 = scmp.ne.s32.totalorder %s255_s1, %s1099_s0  ;;  %s1104_s28 = sshll.u32 %s1202_s15, 4  ;;  %s1105_s28 = int_to_ptr.vmem [resolvable:$false] %s1104_s28 }
  0x72   : > { %s1106_s17 = scalar_lea.vmem %s1105_s28, 512  ;;  %p1107_p4 = scmp.lt.s32.totalorder %s255_s1, %s1105_s28 }
  0x73   : > { %p1102_p6 = pnand %p1100_p1, %p1008_p13  ;;  %p1108_p8 = scmp.lt.s32.totalorder %s1106_s17, %s1099_s0 }
  0x75   : > { %p1103_p12 = pneg %p1102_p6  ;;  %p1109_p7 = por %p1108_p8, %p1107_p4 }
  0x77   : > { %p1110_p0 = pnand %p1109_p7, %p1103_p12 }
  0x79   : > { %1113 = shalt.err (!%p1110_p0)
}
  0x7a   : > { %883 = dma.hbm_to_vmem [thread:$0]  (!%p1329_p2), %s252_s11, 256, %s255_s1, %s1333_s10  }
  0x7b   : > { %p1562_p5 = scmp.ne.s32.totalorder %s1552_s26, 0 }
  0x7c   : > { %s265_s2 = sand.u32 (!%p1562_p5), 1, %s1256_s22   ;;  %s1401_s13 = sand.u32 (!%p1562_p5), 1, %s1182_s19  }
  0x7d   : > { %263 = sbr.rel (%p1562_p5) target bundleno = 712 (0x2c8), region = 40  ;;  %s787_s23 = sshll.u32 (!%p1562_p5), %s1401_s13, 7 }
  0x7e   : > { %s266_s27 = scalar_lea.sflag (!%p1562_p5), [#allocation3], %s265_s2  ;;  %s1404_s16 = scalar_lea.vmem (!%p1562_p5), [#allocation2], %s787_s23 }
  0x7f   : > { %p1563_p13 = scmp.ne.s32.totalorder (!%p1562_p5), %s1550_s24, 0 }
  0x82   : > { %1157 = dma.done.wait (%p1563_p13), %s266_s27, 2048  }
  0x83   : > { %1159 = vsyncadd (%p1563_p13), %s266_s27, 4294965248  ;;  %p1564_p2 = scmp.eq.s32.totalorder %s1256_s22, 0 }
  0x85   : > { %1161 = dma.done.wait (%p1564_p2), [#allocation6], 1280   ;;  %p1565_p11 = pmov %p1564_p2 }
  0x86   : > { %p1566_p9 = pmov %p1564_p2 }
  0x87   : > { %1163 = vsyncadd (%p1565_p11), [#allocation6], 4294966016 }
  0x88   : > { %1165 = dma.done.wait (%p1566_p9), [#allocation9], 1024   ;;  %p1567_p10 = pmov %p1564_p2 }
  0x89   : > { %s791_s1 = sshll.u32 %s1401_s13, 4 }
  0x8a   : > { %1167 = vsyncadd (%p1567_p10), [#allocation9], 4294966272  ;;  %s1421_s26 = scalar_lea.vmem [#allocation10], %s791_s1 }
  0x8b   : > { %1169 = dma.done.wait (%p1563_p13), %s266_s27, 256  }
  0x8c   : > { %1171 = vsyncadd (%p1563_p13), %s266_s27, 4294967040  ;;  %v1203_v0 = vmov 0   ;;  %v938_v1 = vld [vmem:[%s1404_s16 + $0x74] ss:$8 sps:$4 sm:$0xff]   ;;  %v940_v2 = vld [vmem:[%s1404_s16 + $0x70] ss:$8 sps:$4 sm:$0xff]  }
  0x8d   : > { %467 = vmatprep.mubr.bf16.mxu0 %v1203_v0  ;;  %477 = vmatprep.mubr.bf16.mxu1 %v1203_v0  ;;  %v941_v3 = vld [vmem:[%s1404_s16 + $0x64] ss:$8 sps:$4 sm:$0xff]   ;;  %v943_v4 = vld [vmem:[%s1404_s16 + $0x60] ss:$8 sps:$4 sm:$0xff]   ;;  %v944_v5 = vld [vmem:[%s1404_s16 + $0x54] ss:$8 sps:$4 sm:$0xff]  }
  0x8e   : > { %435 = vmatprep.subr.bf16.mxu0 %v938_v1  ;;  %821 = vmatprep.subr.bf16.mxu1 %v938_v1  ;;  %v946_v6 = vld [vmem:[%s1404_s16 + $0x50] ss:$8 sps:$4 sm:$0xff]   ;;  %v947_v7 = vld [vmem:[%s1404_s16 + $0x44] ss:$8 sps:$4 sm:$0xff]   ;;  %v949_v8 = vld [vmem:[%s1404_s16 + $0x40] ss:$8 sps:$4 sm:$0xff]  }
  0x8f   : > { %436 = vmatpush1.bf16.msra.mxu0 %v940_v2  ;;  %829 = vmatpush1.bf16.msra.mxu1 %v940_v2  ;;  %v950_v9 = vld [vmem:[%s1404_s16 + $0x34] ss:$8 sps:$4 sm:$0xff]   ;;  %v952_v10 = vld [vmem:[%s1404_s16 + $0x30] ss:$8 sps:$4 sm:$0xff]   ;;  %v953_v11 = vld [vmem:[%s1404_s16 + $0x24] ss:$8 sps:$4 sm:$0xff]  }
  0x90   : > { %437 = vmatprep.subr.bf16.mxu0 %v941_v3  ;;  %822 = vmatprep.subr.bf16.mxu1 %v941_v3  ;;  %v955_v12 = vld [vmem:[%s1404_s16 + $0x20] ss:$8 sps:$4 sm:$0xff]   ;;  %v956_v13 = vld [vmem:[%s1404_s16 + $0x14] ss:$8 sps:$4 sm:$0xff]   ;;  %v958_v14 = vld [vmem:[%s1404_s16 + $0x10] ss:$8 sps:$4 sm:$0xff]  }
  0x91   : > { %v959_v15 = vld [vmem:[%s1404_s16 + $0x4] ss:$8 sps:$4 sm:$0xff]   ;;  %v961_v16 = vld [vmem:[%s1404_s16] ss:$8 sps:$4 sm:$0xff]   ;;  %s820_s16 = sshll.u32 %s1256_s22, 8  ;;  %p1568_p1 = scmp.ne.s32.totalorder %s1556_s14, 0 }
  0x92   : > { %v962_v17 = vld [vmem:[#allocation5] sm:$0xff]   ;;  %v963_v18 = vld [vmem:[#allocation5 + $0x8] sm:$0xff]   ;;  %s1204_s22 = smov [#allocation11]  }
  0x93   : > { %438 = vmatpush1.bf16.msra.mxu0 %v943_v4  ;;  %830 = vmatpush1.bf16.msra.mxu1 %v943_v4 }
  0x94   : > { %439 = vmatprep.subr.bf16.mxu0 %v944_v5  ;;  %823 = vmatprep.subr.bf16.mxu1 %v944_v5 }
  0x97   : > { %440 = vmatpush1.bf16.msra.mxu0 %v946_v6  ;;  %831 = vmatpush1.bf16.msra.mxu1 %v946_v6 }
  0x98   : > { %441 = vmatprep.subr.bf16.mxu0 %v947_v7  ;;  %824 = vmatprep.subr.bf16.mxu1 %v947_v7 }
  0x9b   : > { %442 = vmatpush1.bf16.msra.mxu0 %v949_v8  ;;  %832 = vmatpush1.bf16.msra.mxu1 %v949_v8 }
  0x9c   : > { %443 = vmatprep.subr.bf16.mxu0 %v950_v9  ;;  %825 = vmatprep.subr.bf16.mxu1 %v950_v9 }
  0x9f   : > { %444 = vmatpush1.bf16.msra.mxu0 %v952_v10  ;;  %833 = vmatpush1.bf16.msra.mxu1 %v952_v10 }
  0xa0   : > { %445 = vmatprep.subr.bf16.mxu0 %v953_v11  ;;  %826 = vmatprep.subr.bf16.mxu1 %v953_v11 }
  0xa3   : > { %446 = vmatpush1.bf16.msra.mxu0 %v955_v12  ;;  %834 = vmatpush1.bf16.msra.mxu1 %v955_v12 }
  0xa4   : > { %447 = vmatprep.subr.bf16.mxu0 %v956_v13  ;;  %827 = vmatprep.subr.bf16.mxu1 %v956_v13 }
  0xa7   : > { %448 = vmatpush1.bf16.msra.mxu0 %v958_v14  ;;  %835 = vmatpush1.bf16.msra.mxu1 %v958_v14 }
  0xa8   : > { %449 = vmatprep.subr.bf16.mxu0 %v959_v15  ;;  %828 = vmatprep.subr.bf16.mxu1 %v959_v15 }
  0xab   : > { %450 = vmatpush1.bf16.msra.mxu0 %v961_v16  ;;  %836 = vmatpush1.bf16.msra.mxu1 %v961_v16 }
  0xae   : > { %468 = vmatmul.mubr.bf16.vlgmr.msra.gmra.mxu0 %v962_v17  ;;  %478 = vmatmul.mubr.bf16.vlgmr.msra.gmra.mxu1 %v963_v18 }
 0x16e   : > { %v1443_v19 = vpop.f32.mrf.mxu0  ;;  %v1445_v20 = vpop.f32.mrf.mxu1 }
 0x16f   : > { %v533_v21 = vmul.f32 %v1445_v20, %v1445_v20  ;;  %v501_v28 = vmul.f32 %v1443_v19, %v1443_v19 }
 0x170   : > { %v1449_v22 = vpop.f32.mrf.mxu0  ;;  %v1451_v23 = vpop.f32.mrf.mxu1 }
 0x171   : > { %v488_v24 = vadd.f32 %v1449_v22, %v1443_v19  ;;  %v502_v25 = vmul.f32 %v1449_v22, %v1449_v22  ;;  %v520_v26 = vadd.f32 %v1451_v23, %v1445_v20  ;;  %v534_v27 = vmul.f32 %v1451_v23, %v1451_v23 }
 0x172   : > { %v1463_v29 = vpop.f32.mrf.mxu0  ;;  %v1465_v30 = vpop.f32.mrf.mxu1 }
 0x173   : > { %v503_v31 = vmul.f32 %v1463_v29, %v1463_v29  ;;  %v535_v32 = vmul.f32 %v1465_v30, %v1465_v30  ;;  %v521_v33 = vadd.f32 %v520_v26, %v1465_v30  ;;  %v489_v34 = vadd.f32 %v488_v24, %v1463_v29 }
 0x174   : > { %v1473_v35 = vpop.f32.mrf.mxu0  ;;  %v1475_v36 = vpop.f32.mrf.mxu1  ;;  %v537_v37 = vadd.f32 %v534_v27, %v533_v21  ;;  %v505_v38 = vadd.f32 %v502_v25, %v501_v28 }
 0x175   : > { %v504_v39 = vmul.f32 %v1473_v35, %v1473_v35  ;;  %v536_v40 = vmul.f32 %v1475_v36, %v1475_v36  ;;  %v522_v41 = vadd.f32 %v521_v33, %v1475_v36  ;;  %v490_v42 = vadd.f32 %v489_v34, %v1473_v35  ;;  %v567_v33 = vld [vmem:[#allocation7 + $0x8] sm:$0xff]  ;;  %v568_v34 = vld [vmem:[#allocation7 + $0x10] sm:$0xff] }
 0x176   : > { %v538_v43 = vadd.f32 %v537_v37, %v535_v32  ;;  %v506_v44 = vadd.f32 %v505_v38, %v503_v31  ;;  %v566_v32 = vld [vmem:[#allocation7] sm:$0xff]  ;;  %v569_v37 = vld [vmem:[#allocation7 + $0x18] sm:$0xff] }
 0x177   : > { %523 = vadd.xlane.f32.xlu1 %v522_v41  ;;  %491 = vadd.xlane.f32.xlu0 %v490_v42  ;;  %v574_v38 = vld [vmem:[#allocation8] sm:$0xff] }
 0x178   : > { %v539_v45 = vadd.f32 %v538_v43, %v536_v40  ;;  %v507_v46 = vadd.f32 %v506_v44, %v504_v39  ;;  %v596_v41 = vld [vmem:[#allocation7 + $0x20] sm:$0xff] }
 0x17b   : > { %540 = vadd.xlane.f32.xlu1 %v539_v45  ;;  %508 = vadd.xlane.f32.xlu0 %v507_v46  ;;  %v597_v46 = vld [vmem:[#allocation7 + $0x28] sm:$0xff] }
 0x200   : > { %v524_v47 = vpop.xlane.xlu1 %523  ;;  %v492_v48 = vpop.xlane.xlu0 %491 }
 0x201   : > { %v525_v49 = vrot.slane %v524_v47, 4  ;;  %v493_v50 = vrot.slane %v492_v48, 4 }
 0x203   : > { %v526_v51 = vadd.f32 %v525_v49, %v524_v47  ;;  %v494_v52 = vadd.f32 %v493_v50, %v492_v48  ;;  %v598_v47 = vld [vmem:[#allocation7 + $0x30] sm:$0xff]  ;;  %v599_v48 = vld [vmem:[#allocation7 + $0x38] sm:$0xff] }
 0x204   : > { %v541_v53 = vpop.xlane.xlu1 %540  ;;  %v509_v54 = vpop.xlane.xlu0 %508  ;;  %v576_v49 = vld [vmem:[#allocation8 + $0x10] sm:$0xff]  ;;  %v577_v50 = vld [vmem:[#allocation8 + $0x18] sm:$0xff] }
 0x205   : > { %v527_v55 = vrot.slane %v526_v51, 2  ;;  %v495_v56 = vrot.slane %v494_v52, 2  ;;  %v542_v57 = vrot.slane %v541_v53, 4  ;;  %v510_v58 = vrot.slane %v509_v54, 4 }
 0x207   : > { %v543_v59 = vadd.f32 %v542_v57, %v541_v53  ;;  %v511_v60 = vadd.f32 %v510_v58, %v509_v54  ;;  %v496_v61 = vadd.f32 %v495_v56, %v494_v52  ;;  %v528_v62 = vadd.f32 %v527_v55, %v526_v51  ;;  %v605_v54 = vld [vmem:[#allocation8 + $0x28] sm:$0xff]  ;;  %v607_v55 = vld [vmem:[#allocation8 + $0x38] sm:$0xff] }
 0x209   : > { %v544_v63 = vrot.slane %v543_v59, 2  ;;  %v512_v0 = vrot.slane %v511_v60, 2  ;;  %v497_v1 = vrot.slane %v496_v61, 1  ;;  %v529_v5 = vrot.slane %v528_v62, 1 }
 0x20b   : > { %v545_v2 = vadd.f32 %v544_v63, %v543_v59  ;;  %v513_v3 = vadd.f32 %v512_v0, %v511_v60  ;;  %v498_v4 = vadd.f32 %v497_v1, %v496_v61  ;;  %v530_v10 = vadd.f32 %v529_v5, %v528_v62 }
 0x20d   : > { %837 = vpush %v498_v4  ;;  %v514_v6 = vrot.slane %v513_v3, 1  ;;  %v546_v7 = vrot.slane %v545_v2, 1 }
 0x20f   : > { %v515_v8 = vadd.f32 %v514_v6, %v513_v3  ;;  %v547_v9 = vadd.f32 %v546_v7, %v545_v2 }
 0x211   : > { %839 = vpush %v515_v8 }
 0x212   : > { %841 = vpush %v530_v10 }
 0x213   : > { %843 = vpush %v547_v9 }
 0x23e   : > { %s838_s24 = spop %837 }
 0x23f   : > { %s500_s9 = smul.f32 0.00024414063, %s838_s24  ;;  %s321_s24 = scalar_lea.vmem [#allocation11], %s791_s1 }
 0x240   : > { %s1118_s1 = sshll.u32 %s1204_s22, 4  ;;  %s1119_s1 = int_to_ptr.vmem [resolvable:$false] %s1118_s1 }
 0x241   : > { %s518_s10 = smul.f32 %s500_s9, %s500_s9  ;;  %v552_v15 = vstv %s500_s9  ;;  %s655_s9 = sshll.u32 %s321_s24, 4  ;;  %s656_s9 = int_to_ptr.vmem [resolvable:$true] %s655_s9 }
 0x242   : > { %s840_s12 = spop %839  ;;  %v553_v16 = vsub.f32 %v1443_v19, %v552_v15  ;;  %v554_v17 = vsub.f32 %v1449_v22, %v552_v15  ;;  %v555_v18 = vsub.f32 %v1463_v29, %v552_v15  ;;  %v556_v21 = vsub.f32 %v1473_v35, %v552_v15  ;;  %v575_v22 = vld [vmem:[#allocation8 + $0x8] sm:$0xff]  ;;  %p1121_p4 = scmp.lt.s32.totalorder %s656_s9, %s1119_s1 }
 0x243   : > { %s517_s11 = smul.f32 0.00024414063, %s840_s12  ;;  %s842_s6 = spop %841 }
 0x244   : > { %s532_s29 = smul.f32 0.00024414063, %s842_s6  ;;  %s844_s8 = spop %843 }
 0x245   : > { %s519_s7 = ssub.f32 %s517_s11, %s518_s10  ;;  %s549_s0 = smul.f32 0.00024414063, %s844_s8 }
 0x246   : > { %s550_s15 = smul.f32 %s532_s29, %s532_s29  ;;  %v582_v24 = vstv %s532_s29  ;;  %s1499_s11 = scalar_lea.hbm %s1541_s5, %s820_s16 }
 0x247   : > { %s557_s28 = sadd.f32 1e-05, %s519_s7  ;;  %v583_v19 = vsub.f32 %v1445_v20, %v582_v24  ;;  %v584_v29 = vsub.f32 %v1451_v23, %v582_v24  ;;  %v585_v35 = vsub.f32 %v1465_v30, %v582_v24  ;;  %v586_v39 = vsub.f32 %v1475_v36, %v582_v24  ;;  %v604_v23 = vld [vmem:[#allocation8 + $0x20] sm:$0xff]  ;;  %v606_v30 = vld [vmem:[#allocation8 + $0x30] sm:$0xff]  ;;  %s1114_s6 = scalar_lea.vmem %s656_s9, 256 }
 0x248   : > { %s551_s17 = ssub.f32 %s549_s0, %s550_s15  ;;  %p1115_p3 = scmp.ne.s32.totalorder %s656_s9, %s1114_s6 }
 0x249   : > { %v558_v11 = vstv %s557_s28  ;;  %s1120_s29 = scalar_lea.vmem %s1119_s1, 512 }
 0x24a   : > { %964 = vrsqrt.f32 %v558_v11  ;;  %s587_s2 = sadd.f32 1e-05, %s551_s17  ;;  %p1116_p6 = pnand %p1115_p3, %p1568_p1 }
 0x24b   : > { %p1122_p8 = scmp.lt.s32.totalorder %s1120_s29, %s1114_s6 }
 0x24c   : > { %v588_v12 = vstv %s587_s2  ;;  %p1117_p12 = pneg %p1116_p6 }
 0x24d   : > { %966 = vrsqrt.f32 %v588_v12  ;;  %p1123_p7 = por %p1122_p8, %p1121_p4 }
 0x24f   : > { %p1124_p0 = pnand %p1123_p7, %p1117_p12 }
 0x257   : > { %v965_v13 = vpop.eup %964 }
 0x258   : > { %845 = vpush %v965_v13 }
 0x25a   : > { %v967_v14 = vpop.eup %966 }
 0x25b   : > { %847 = vpush %v967_v14  ;;  %v630_v14 = vld [vmem:[%s1421_s26] sm:$0xff] }
 0x289   : > { %s846_s23 = spop %845 }
 0x28a   : > { %v561_v25 = vstv %s846_s23 }
 0x28b   : > { %v562_v26 = vmul.f32 %v561_v25, %v553_v16  ;;  %v563_v27 = vmul.f32 %v561_v25, %v554_v17  ;;  %v564_v28 = vmul.f32 %v561_v25, %v555_v18  ;;  %v565_v31 = vmul.f32 %v561_v25, %v556_v21  ;;  %v631_v16 = vld [vmem:[%s1421_s26 + $0x8] sm:$0xff]  ;;  %s641_s26 = scalar_lea.sflag [#allocation4], %s1401_s13 }
 0x28c   : > { %s848_s27 = spop %847 }
 0x28d   : > { %v591_v40 = vstv %s848_s27  ;;  %v570_v42 = vmul.f32 %v566_v32, %v562_v26  ;;  %v571_v43 = vmul.f32 %v567_v33, %v563_v27  ;;  %v572_v44 = vmul.f32 %v568_v34, %v564_v28 }
 0x28e   : > { %v573_v45 = vmul.f32 %v569_v37, %v565_v31  ;;  %v592_v20 = vmul.f32 %v591_v40, %v583_v19  ;;  %v593_v51 = vmul.f32 %v591_v40, %v584_v29  ;;  %v594_v52 = vmul.f32 %v591_v40, %v585_v35 }
 0x28f   : > { %v595_v53 = vmul.f32 %v591_v40, %v586_v39  ;;  %v578_v59 = vadd.f32 %v574_v38, %v570_v42  ;;  %v579_v60 = vadd.f32 %v575_v22, %v571_v43  ;;  %v580_v61 = vadd.f32 %v576_v49, %v572_v44 }
 0x290   : > { %v600_v36 = vmul.f32 %v596_v41, %v592_v20  ;;  %v601_v56 = vmul.f32 %v597_v46, %v593_v51  ;;  %v602_v57 = vmul.f32 %v598_v47, %v594_v52  ;;  %v581_v62 = vadd.f32 %v577_v50, %v573_v45 }
 0x291   : > { %v603_v58 = vmul.f32 %v599_v48, %v595_v53 }
 0x292   : > { %v608_v63 = vadd.f32 %v604_v23, %v600_v36  ;;  %v609_v0 = vadd.f32 %v605_v54, %v601_v56  ;;  %v610_v1 = vadd.f32 %v606_v30, %v602_v57 }
 0x293   : > { %v611_v2 = vadd.f32 %v607_v55, %v603_v58 }
 0x294   : > { %v612_v3 = vadd.f32 %v608_v63, %v578_v59  ;;  %v613_v4 = vadd.f32 %v609_v0, %v579_v60  ;;  %v614_v5 = vadd.f32 %v610_v1, %v580_v61 }
 0x295   : > { %v615_v6 = vadd.f32 %v611_v2, %v581_v62 }
 0x296   : > { %v811_v7 = vmul.f32 -1.442695, %v614_v5 }
 0x297   : > { %v812_v8 = vmul.f32 -1.442695, %v615_v6 }
 0x298   : > { %968 = vpow2.f32 %v811_v7 }
 0x299   : > { %970 = vpow2.f32 %v812_v8 }
 0x29a   : > { %972 = vtanh.f32 %v612_v3 }
 0x29b   : > { %974 = vtanh.f32 %v613_v4 }
 0x2a5   : > { %v969_v9 = vpop.eup %968 }
 0x2a6   : > { %v971_v10 = vpop.eup %970  ;;  %v624_v11 = vadd.f32 1.0, %v969_v9 }
 0x2a7   : > { %v625_v12 = vadd.f32 1.0, %v971_v10  ;;  %v973_v13 = vpop.eup %972 }
 0x2a8   : > { %976 = vrcp.f32 %v624_v11  ;;  %v975_v15 = vpop.eup %974  ;;  %v632_v17 = vsub.f32 %v973_v13, %v630_v14 }
 0x2a9   : > { %978 = vrcp.f32 %v625_v12  ;;  %v633_v21 = vsub.f32 %v975_v15, %v631_v16 }
 0x2b5   : > { %v977_v18 = vpop.eup %976 }
 0x2b6   : > { %v979_v24 = vpop.eup %978  ;;  %v634_v25 = vmul.f32 %v977_v18, %v632_v17 }
 0x2b7   : > { %v635_v26 = vmul.f32 %v979_v24, %v633_v21 }
 0x2b8   : > { %v636_v27 = vadd.f32 %v634_v25, %v630_v14 }
 0x2b9   : > { %v637_v28 = vadd.f32 %v635_v26, %v631_v16 }
 0x2ba   : > { %638 = vst [vmem:[%s321_s24] sm:$0xff] %v636_v27 }
 0x2bb   : > { %639 = vst [vmem:[%s321_s24 + $0x8] sm:$0xff] %v637_v28 }
 0x2bc   : > { %1127 = shalt.err (!%p1124_p0)
}
 0x2bd   : > { %s1128_s8 = scalar_lea.hbm %s1499_s11, 256  ;;  %s1132_s0 = scalar_lea.hbm %s1541_s5, 512 }
 0x2be   : > { %p1129_p5 = scmp.ne.s32.totalorder %s1499_s11, %s1128_s8  ;;  %p1133_p11 = scmp.lt.s32.totalorder %s1499_s11, %s1541_s5 }
 0x2bf   : > { %p1134_p9 = scmp.lt.s32.totalorder %s1132_s0, %s1128_s8 }
 0x2c0   : > { %p1130_p13 = pnand %p1129_p5, %p1568_p1 }
 0x2c1   : > { %p1135_p10 = por %p1134_p9, %p1133_p11 }
 0x2c2   : > { %p1131_p2 = pneg %p1130_p13 }
 0x2c4   : > { %p1136_p3 = pnand %p1135_p10, %p1131_p2 }
 0x2c6   : > { %1139 = shalt.err (!%p1136_p3)
}
 0x2c7   : > { %865 = dma.vmem_to_hbm [thread:$0]  (%p1568_p1), %s656_s9, 256, %s1499_s11, %s641_s26  }
 0x2c8 PF: > { %s667_s17 = sand.u32 1, %s1178_s18   ;;  %p1569_p6 = scmp.ne.s32.totalorder %s1551_s25, 0 }
 0x2c9   : > { %p1570_p12 = scmp.ge.s32.totalorder %s1190_s21, 2  ;;  %s668_s2 = scalar_lea.sflag [#allocation4], %s667_s17 }
 0x2cb   : > { %p885_p4 = pnand %p1570_p12, %p1569_p6 }
 0x2cd   : > { %p886_p8 = pneg %p885_p4 }
 0x2cf   : > { %1173 = dma.done.wait (%p886_p8), %s668_s2, 256  }
 0x2d0   : > { %1175 = vsyncadd (%p886_p8), %s668_s2, 4294967040  ;;  %s1571_s23 = sld [smem:[#allocation17_spill]]  ;;  %p20_p7 = scmp.ge.s32.totalorder %s1289_s30, 4  }
 0x2d1   : > { %s1572_s18 = smov %s1182_s19  ;;  %s1573_s19 = smov %s1186_s20 }
 0x2d2   : > { %s1575_s21 = smov %s1289_s30  ;;  %22 = sbr.rel (!%p20_p7) target bundleno = 11 (0xb), region = 108 }
 0x2d6   : > { %s1574_s20 = smov %s1571_s23 }
 0x2d7   :  { %673 = vsyncpa [#allocation3], 1 }
 0x2d8   :  { %675 = vsyncpa [#allocation3 + $0x1], 1 }
 0x2d9   :  { %676 = vsyncpa [#allocation6], 1 }
 0x2da   :  { %677 = vsyncpa [#allocation9], 1 }
 0x2db   :  { %678 = vsyncpa [#allocation4], 1 }
 0x2dc   :  { %680 = vsyncpa [#allocation4 + $0x1], 1 }

</bundles_post_ra>
